<compile_context>
chip_gen: v6e
topology: v6e:2x2x1
jax: 0.10.0
libtpu: 0.0.40
codegen_flags: <defaults>
</compile_context>

<pallas_src>
import functools

import jax
import jax.numpy as jnp
from jax.experimental import pallas as pl
from jax.experimental.pallas import tpu as pltpu

_LANE = 128  # vreg lane width; channel-like dims are padded to a multiple of this.


def _round_up(n, m):
    return ((n + m - 1) // m) * m


def _energy_kernel(x_ref, w1_ref, b1_ref, g1_ref, be1_ref,
                   w2_ref, b2_ref, g2_ref, be2_ref,
                   wl_ref, bounds_ref, emb_ref, bl_ref,
                   out_ref, pred_ref, *, alpha, seq_len, f_real, eps=1e-5):
    x = x_ref[...]                                   # (N, Dp) f32, N = B*T (flattened)
    n = x.shape[0]

    # Per-utterance boundary masks: the batch is flattened along the sublane axis,
    # so pltpu.roll wraps across utterance seams; those rows must read zero padding.
    row = jax.lax.broadcasted_iota(jnp.int32, (n, 1), 0)
    is_first = (row % seq_len) == 0
    is_last = (row % seq_len) == (seq_len - 1)

    inv_f = 1.0 / f_real

    def conv_ln_relu(v, w_ref, b_ref, g_ref, be_ref):
        # Conv1d(kernel=3, padding=1) as ONE fused MXU matmul: build
        # [v(t-1) | v(t) | v(t+1)] along the lane axis (XLU roll + VPU select,
        # no sublane-shift concatenate copies) and contract it against the packed
        # (3*C_in_pad, C_out_pad) weight.  bf16 operands, f32 accumulation.
        v_prev = jnp.where(is_first, 0.0, pltpu.roll(v, 1, axis=0))
        v_next = jnp.where(is_last, 0.0, pltpu.roll(v, n - 1, axis=0))
        cat = jnp.concatenate([v_prev, v, v_next], axis=-1).astype(jnp.bfloat16)
        h = jnp.dot(cat, w_ref[...], preferred_element_type=jnp.float32) + b_ref[...]
        # LayerNorm over the real (unpadded) channel count, in f32.  Padded output
        # channels are exactly zero (zero weights/bias), so plain lane sums equal
        # sums over the real channels; gamma/beta pads of zero keep them zero.
        mu = jnp.sum(h, axis=-1, keepdims=True) * inv_f
        ex2 = jnp.sum(h * h, axis=-1, keepdims=True) * inv_f
        var = ex2 - mu * mu
        h = (h - mu) * jax.lax.rsqrt(var + eps) * g_ref[...] + be_ref[...]
        return jnp.maximum(h, 0.0)

    h = conv_ln_relu(x, w1_ref, b1_ref, g1_ref, be1_ref)
    h = conv_ln_relu(h, w2_ref, b2_ref, g2_ref, be2_ref)

    # Linear(F -> 1) as an f32 lane reduction; the bias scalar comes from SMEM.
    pred = jnp.sum(h * wl_ref[...], axis=-1, keepdims=True) + bl_ref[0]     # (N, 1)

    # Energy path (target=None): scale, clamp, bucketize (== searchsorted 'left'),
    # then the embedding lookup as a one-hot bf16 matmul on the MXU.
    energy = jnp.clip(pred * alpha, 0.0, 1.0)
    bounds = bounds_ref[...]                         # (1, Vp) f32; padded entries are 2.0 (> 1)
    idx = jnp.sum((bounds < energy).astype(jnp.int32), axis=-1, keepdims=True)
    vp = bounds.shape[1]
    onehot = (jax.lax.broadcasted_iota(jnp.int32, (n, vp), 1) == idx).astype(jnp.bfloat16)
    emb = jnp.dot(onehot, emb_ref[...], preferred_element_type=jnp.float32)  # (N, Dp) f32

    out_ref[...] = x + emb
    # Lane-dense pred store: broadcast across the full 128-lane width so the store
    # is an unmasked vst; the wrapper slices lane 0.
    pred_ref[...] = jnp.broadcast_to(pred, (n, pred_ref.shape[-1]))


def pack_params(raw):
    """PyTorch-layout params -> padded / packed / bf16 kernel layout.

    Returns (kernel_params, f_real) where f_real is the un-padded LayerNorm width.
    """
    (w1, b1, g1, be1, w2, b2, g2, be2, wl, bl, bounds, emb) = raw
    F = b1.shape[0]
    V = bounds.shape[0]
    D = w1.shape[1]
    Dp = _round_up(D, _LANE)
    Fp = _round_up(F, _LANE)
    Vp = _round_up(V, _LANE)

    def pack_conv(w, cin_pad, cout_pad):
        # torch Conv1d weight (C_out, C_in, K) -> packed (K*C_in_pad, C_out_pad) bf16,
        # k-major so rows line up with the in-kernel [prev | cur | next] lane concat.
        cout, cin, k = w.shape
        wt = jnp.transpose(w, (2, 1, 0))                                  # (K, C_in, C_out)
        wt = jnp.pad(wt, ((0, 0), (0, cin_pad - cin), (0, cout_pad - cout)))
        return wt.reshape(k * cin_pad, cout_pad).astype(jnp.bfloat16)

    w1p = pack_conv(w1, Dp, Fp)
    w2p = pack_conv(w2, Fp, Fp)

    def pad_f(v):
        return jnp.pad(v.reshape(-1), (0, Fp - F)).reshape(1, Fp).astype(jnp.float32)

    b1p, g1p, be1p = pad_f(b1), pad_f(g1), pad_f(be1)
    b2p, g2p, be2p = pad_f(b2), pad_f(g2), pad_f(be2)
    wlp = pad_f(wl)
    # Pad boundaries with a value > 1 so clamped energies never select a padded bin.
    boundsp = jnp.pad(bounds, (0, Vp - V), constant_values=2.0).reshape(1, Vp).astype(jnp.float32)
    embp = jnp.pad(emb, ((0, Vp - V), (0, Dp - D))).astype(jnp.bfloat16)
    blp = bl.reshape(1).astype(jnp.float32)          # scalar -> SMEM
    return (w1p, b1p, g1p, be1p, w2p, b2p, g2p, be2p, wlp, boundsp, embp, blp), F


def energy_regulator_forward(x, kparams, *, f_real, alpha=1.0):
    """Returns (x + embeddings, energy_predictor_output) with PyTorch eval-mode shapes."""
    B, T, D = x.shape
    (w1p, b1, g1, be1, w2p, b2, g2, be2, wl, bounds, emb, bl) = kparams
    dp = emb.shape[1]                                # lane-padded encoder dim
    n = B * T

    x2 = x.reshape(n, D)
    if dp != D:
        # No-op at production sizes where D is already a multiple of 128.
        x2 = jnp.pad(x2, ((0, 0), (0, dp - D)))

    kernel = functools.partial(_energy_kernel, alpha=float(alpha),
                               seq_len=T, f_real=float(f_real))

    vmem = pl.BlockSpec(memory_space=pltpu.MemorySpace.VMEM)
    smem = pl.BlockSpec(memory_space=pltpu.MemorySpace.SMEM)

    out2, pred2 = pl.pallas_call(
        kernel,
        out_shape=(jax.ShapeDtypeStruct((n, dp), x.dtype),
                   jax.ShapeDtypeStruct((n, _LANE), jnp.float32)),
        in_specs=[vmem] * 12 + [smem],
        out_specs=(vmem, vmem),
        compiler_params=pltpu.CompilerParams(vmem_limit_bytes=32 * 1024 * 1024),
    )(x2, w1p, b1, g1, be1, w2p, b2, g2, be2, wl, bounds, emb, bl)

    out = out2[:, :D].reshape(B, T, D)[None]         # (1, B, T, D)
    energy_pred = pred2[:, 0].reshape(B, T)[None]    # (1, B, T): squeeze() + unsqueeze(0)
    return out, energy_pred


def init_params(key, D, F, V, K=3):
    """Deterministic synthetic params in PyTorch layout (Conv1d / Linear / Embedding)."""
    ks = jax.random.split(key, 7)
    s = 0.1
    w1 = jax.random.normal(ks[0], (F, D, K), jnp.float32) * s    # Conv1d (C_out, C_in, K)
    b1 = jax.random.normal(ks[1], (F,), jnp.float32) * s
    w2 = jax.random.normal(ks[2], (F, F, K), jnp.float32) * s
    b2 = jax.random.normal(ks[3], (F,), jnp.float32) * s
    wl = jax.random.normal(ks[4], (1, F), jnp.float32) * s       # Linear (out=1, in=F)
    bl = jax.random.normal(ks[5], (1,), jnp.float32) * s
    emb = jax.random.normal(ks[6], (V, D), jnp.float32)          # nn.Embedding default N(0,1)
    g1 = jnp.ones((F,), jnp.float32); be1 = jnp.zeros((F,), jnp.float32)
    g2 = jnp.ones((F,), jnp.float32); be2 = jnp.zeros((F,), jnp.float32)
    bounds = jnp.linspace(0.0, 1.0, V).astype(jnp.float32)
    return (w1, b1, g1, be1, w2, b2, g2, be2, wl, bl, bounds, emb)


def ref_forward(x, raw, alpha=1.0):
    """Plain-JAX reference (PyTorch eval-mode semantics), mirroring the kernel's
    mixed precision: bf16 matmul operands / embedding table, f32 everything else."""
    (w1, b1, g1, be1, w2, b2, g2, be2, wl, bl, bounds, emb) = raw

    def conv3(v, w, b):
        wt = jnp.transpose(w, (2, 1, 0))                              # (K, C_in, C_out)
        z = jnp.zeros_like(v[:, :1])
        vp = jnp.concatenate([z, v[:, :-1]], axis=1)
        vn = jnp.concatenate([v[:, 1:], z], axis=1)
        cat = jnp.concatenate([vp, v, vn], axis=-1).astype(jnp.bfloat16)
        wp = wt.reshape(-1, wt.shape[-1]).astype(jnp.bfloat16)        # (3*C_in, C_out)
        return jnp.einsum('btc,cf->btf', cat, wp,
                          preferred_element_type=jnp.float32) + b

    def ln_relu(v, g, be, eps=1e-5):
        mu = v.mean(-1, keepdims=True)
        var = ((v - mu) ** 2).mean(-1, keepdims=True)
        return jnp.maximum((v - mu) * jax.lax.rsqrt(var + eps) * g + be, 0.0)

    h = ln_relu(conv3(x, w1, b1), g1, be1)
    h = ln_relu(conv3(h, w2, b2), g2, be2)
    pred = (h * wl[0]).sum(-1) + bl[0]                # (B, T)
    pred_u = pred[None]                               # (1, B, T)
    energy = jnp.clip(pred_u * alpha, 0.0, 1.0)
    idx = jnp.searchsorted(bounds, energy.reshape(-1), side="left").reshape(energy.shape)
    emb_bf = emb.astype(jnp.bfloat16).astype(jnp.float32)
    out = x + emb_bf[idx]                             # (1, B, T, D)
    return out, pred_u


if __name__ == "__main__":
    B, T, D = 2, 8, 32        # batch, seq len, encoder_dim
    F, V = 32, 8              # feature_predictor_filter_size, energy_vocab
    alpha = 1.0

    key = jax.random.PRNGKey(0)
    kx, kp = jax.random.split(key)
    x = jax.random.normal(kx, (B, T, D), jnp.float32)
    raw = init_params(kp, D, F, V)
    kparams, f_real = pack_params(raw)

    out, pred = energy_regulator_forward(x, kparams, f_real=f_real, alpha=alpha)
    out = jax.block_until_ready(out)
    pred = jax.block_until_ready(pred)

    assert out.shape == (1, B, T, D) and pred.shape == (1, B, T)

    # 1) Predictor output vs. the independent reference (fp tolerance).
    out_ref, pred_ref = ref_forward(x, raw, alpha=alpha)
    assert jnp.allclose(pred, pred_ref, atol=1e-3, rtol=1e-3), \
        f"pred mismatch: {float(jnp.max(jnp.abs(pred - pred_ref)))}"

    # 2) Energy -> bucketize -> embedding -> residual path, validated against an
    #    independent JAX implementation fed with the kernel's own pred (bucketize is
    #    a step function, so fp-level pred noise could otherwise flip a bin).
    *_, bounds_raw, emb_raw = raw
    energy_k = jnp.clip(pred * alpha, 0.0, 1.0)
    idx_k = jnp.searchsorted(bounds_raw, energy_k.reshape(-1),
                             side="left").reshape(energy_k.shape)
    out_expected = x + emb_raw.astype(jnp.bfloat16).astype(jnp.float32)[idx_k]
    assert jnp.allclose(out, out_expected, atol=1e-5, rtol=1e-5), \
        f"out mismatch: {float(jnp.max(jnp.abs(out - out_expected)))}"

    print("KERNEL_OK")
</pallas_src>

<mosaic_0001>
module attributes {stable_mosaic.version = 11 : i64} {
  func.func @_energy_kernel(%arg0: memref<16x128xf32, #tpu.memory_space<vmem>>, %arg1: memref<384x128xbf16, #tpu.memory_space<vmem>>, %arg2: memref<1x128xf32, #tpu.memory_space<vmem>>, %arg3: memref<1x128xf32, #tpu.memory_space<vmem>>, %arg4: memref<1x128xf32, #tpu.memory_space<vmem>>, %arg5: memref<384x128xbf16, #tpu.memory_space<vmem>>, %arg6: memref<1x128xf32, #tpu.memory_space<vmem>>, %arg7: memref<1x128xf32, #tpu.memory_space<vmem>>, %arg8: memref<1x128xf32, #tpu.memory_space<vmem>>, %arg9: memref<1x128xf32, #tpu.memory_space<vmem>>, %arg10: memref<1x128xf32, #tpu.memory_space<vmem>>, %arg11: memref<128x128xbf16, #tpu.memory_space<vmem>>, %arg12: memref<1xf32, #tpu.memory_space<smem>>, %arg13: memref<16x128xf32, #tpu.memory_space<vmem>>, %arg14: memref<16x128xf32, #tpu.memory_space<vmem>>) attributes {dimension_semantics = [], scalar_prefetch = 0 : i64, scratch_operands = 0 : i64, tpu.core_type = #tpu.core_type<tc>} {
    %c0 = arith.constant 0 : index
    %c0_0 = arith.constant 0 : index
    %0 = vector.load %arg0[%c0, %c0_0] : memref<16x128xf32, #tpu.memory_space<vmem>>, vector<16x128xf32>
    %1 = tpu.iota {dimensions = array<i32: 0>} : vector<16x1xi32>
    %c8_i32 = arith.constant 8 : i32
    %c0_i32 = arith.constant 0 : i32
    %2 = arith.cmpi eq, %c8_i32, %c0_i32 : i32
    %c1_i32 = arith.constant 1 : i32
    %3 = arith.select %2, %c1_i32, %c8_i32 : i32
    %4 = vector.broadcast %3 : i32 to vector<16x1xi32>
    %5 = arith.remsi %1, %4 : vector<16x1xi32>
    %c0_i32_1 = arith.constant 0 : i32
    %6 = vector.broadcast %c0_i32_1 : i32 to vector<16x1xi32>
    %7 = arith.cmpi ne, %5, %6 : vector<16x1xi32>
    %c0_i32_2 = arith.constant 0 : i32
    %8 = vector.broadcast %c0_i32_2 : i32 to vector<16x1xi32>
    %9 = arith.cmpi slt, %5, %8 : vector<16x1xi32>
    %c0_i32_3 = arith.constant 0 : i32
    %10 = arith.cmpi slt, %3, %c0_i32_3 : i32
    %11 = vector.broadcast %10 : i1 to vector<16x1xi1>
    %12 = vector.broadcast %11 : vector<16x1xi1> to vector<16x1xi1>
    %13 = arith.xori %9, %12 : vector<16x1xi1>
    %14 = arith.andi %13, %7 : vector<16x1xi1>
    %15 = vector.broadcast %3 : i32 to vector<16x1xi32>
    %16 = arith.addi %5, %15 : vector<16x1xi32>
    %17 = arith.select %14, %16, %5 : vector<16x1xi1>, vector<16x1xi32>
    %c0_i32_4 = arith.constant 0 : i32
    %18 = vector.broadcast %c0_i32_4 : i32 to vector<16x1xi32>
    %19 = arith.cmpi eq, %17, %18 : vector<16x1xi32>
    %c8_i32_5 = arith.constant 8 : i32
    %c0_i32_6 = arith.constant 0 : i32
    %20 = arith.cmpi eq, %c8_i32_5, %c0_i32_6 : i32
    %c1_i32_7 = arith.constant 1 : i32
    %21 = arith.select %20, %c1_i32_7, %c8_i32_5 : i32
    %22 = vector.broadcast %21 : i32 to vector<16x1xi32>
    %23 = arith.remsi %1, %22 : vector<16x1xi32>
    %c0_i32_8 = arith.constant 0 : i32
    %24 = vector.broadcast %c0_i32_8 : i32 to vector<16x1xi32>
    %25 = arith.cmpi ne, %23, %24 : vector<16x1xi32>
    %c0_i32_9 = arith.constant 0 : i32
    %26 = vector.broadcast %c0_i32_9 : i32 to vector<16x1xi32>
    %27 = arith.cmpi slt, %23, %26 : vector<16x1xi32>
    %c0_i32_10 = arith.constant 0 : i32
    %28 = arith.cmpi slt, %21, %c0_i32_10 : i32
    %29 = vector.broadcast %28 : i1 to vector<16x1xi1>
    %30 = vector.broadcast %29 : vector<16x1xi1> to vector<16x1xi1>
    %31 = arith.xori %27, %30 : vector<16x1xi1>
    %32 = arith.andi %31, %25 : vector<16x1xi1>
    %33 = vector.broadcast %21 : i32 to vector<16x1xi32>
    %34 = arith.addi %23, %33 : vector<16x1xi32>
    %35 = arith.select %32, %34, %23 : vector<16x1xi1>, vector<16x1xi32>
    %c7_i32 = arith.constant 7 : i32
    %36 = vector.broadcast %c7_i32 : i32 to vector<16x1xi32>
    %37 = arith.cmpi eq, %35, %36 : vector<16x1xi32>
    %c1_i32_11 = arith.constant 1 : i32
    %38 = tpu.dynamic_rotate %0 by %c1_i32_11 dim 0 : vector<16x128xf32>, i32 -> vector<16x128xf32>
    %cst = arith.constant 0.000000e+00 : f32
    %39 = vector.shape_cast %19 : vector<16x1xi1> to vector<16x1xi1>
    %40 = vector.broadcast %39 : vector<16x1xi1> to vector<16x128xi1>
    %41 = vector.broadcast %cst : f32 to vector<16x128xf32>
    %42 = arith.select %40, %41, %38 : vector<16x128xi1>, vector<16x128xf32>
    %c15_i32 = arith.constant 15 : i32
    %43 = tpu.dynamic_rotate %0 by %c15_i32 dim 0 : vector<16x128xf32>, i32 -> vector<16x128xf32>
    %cst_12 = arith.constant 0.000000e+00 : f32
    %44 = vector.shape_cast %37 : vector<16x1xi1> to vector<16x1xi1>
    %45 = vector.broadcast %44 : vector<16x1xi1> to vector<16x128xi1>
    %46 = vector.broadcast %cst_12 : f32 to vector<16x128xf32>
    %47 = arith.select %45, %46, %43 : vector<16x128xi1>, vector<16x128xf32>
    %48 = tpu.concatenate %42, %0, %47 in 1 : vector<16x128xf32>, vector<16x128xf32>, vector<16x128xf32> -> vector<16x384xf32>
    %49 = arith.truncf %48 : vector<16x384xf32> to vector<16x384xbf16>
    %c0_13 = arith.constant 0 : index
    %c0_14 = arith.constant 0 : index
    %50 = vector.load %arg1[%c0_13, %c0_14] : memref<384x128xbf16, #tpu.memory_space<vmem>>, vector<384x128xbf16>
    %cst_15 = arith.constant dense<0.000000e+00> : vector<16x128xf32>
    %51 = tpu.matmul %49, %50, %cst_15 {dimension_numbers = #tpu.dot_dimension_numbers<[1], [0], [0], [1], [0, 0, 1, 1], [], []>} : vector<16x384xbf16>, vector<384x128xbf16>, vector<16x128xf32> -> vector<16x128xf32>
    %c0_16 = arith.constant 0 : index
    %c0_17 = arith.constant 0 : index
    %52 = vector.load %arg2[%c0_16, %c0_17] : memref<1x128xf32, #tpu.memory_space<vmem>>, vector<1x128xf32>
    %53 = vector.broadcast %52 : vector<1x128xf32> to vector<16x128xf32>
    %54 = arith.addf %51, %53 : vector<16x128xf32>
    %cst_18 = arith.constant dense<0.000000e+00> : vector<16xf32>
    %55 = vector.multi_reduction <add>, %54, %cst_18 [1] : vector<16x128xf32> to vector<16xf32>
    %56 = vector.shape_cast %55 : vector<16xf32> to vector<16x1xf32>
    %cst_19 = arith.constant 3.125000e-02 : f32
    %57 = vector.broadcast %cst_19 : f32 to vector<16x1xf32>
    %58 = arith.mulf %56, %57 : vector<16x1xf32>
    %59 = arith.mulf %54, %54 : vector<16x128xf32>
    %cst_20 = arith.constant dense<0.000000e+00> : vector<16xf32>
    %60 = vector.multi_reduction <add>, %59, %cst_20 [1] : vector<16x128xf32> to vector<16xf32>
    %61 = vector.shape_cast %60 : vector<16xf32> to vector<16x1xf32>
    %cst_21 = arith.constant 3.125000e-02 : f32
    %62 = vector.broadcast %cst_21 : f32 to vector<16x1xf32>
    %63 = arith.mulf %61, %62 : vector<16x1xf32>
    %64 = arith.mulf %58, %58 : vector<16x1xf32>
    %65 = arith.subf %63, %64 : vector<16x1xf32>
    %66 = vector.broadcast %58 : vector<16x1xf32> to vector<16x128xf32>
    %67 = arith.subf %54, %66 : vector<16x128xf32>
    %cst_22 = arith.constant 9.99999974E-6 : f32
    %68 = vector.broadcast %cst_22 : f32 to vector<16x1xf32>
    %69 = arith.addf %65, %68 : vector<16x1xf32>
    %70 = math.rsqrt %69 : vector<16x1xf32>
    %71 = vector.broadcast %70 : vector<16x1xf32> to vector<16x128xf32>
    %72 = arith.mulf %67, %71 : vector<16x128xf32>
    %c0_23 = arith.constant 0 : index
    %c0_24 = arith.constant 0 : index
    %73 = vector.load %arg3[%c0_23, %c0_24] : memref<1x128xf32, #tpu.memory_space<vmem>>, vector<1x128xf32>
    %74 = vector.broadcast %73 : vector<1x128xf32> to vector<16x128xf32>
    %75 = arith.mulf %72, %74 : vector<16x128xf32>
    %c0_25 = arith.constant 0 : index
    %c0_26 = arith.constant 0 : index
    %76 = vector.load %arg4[%c0_25, %c0_26] : memref<1x128xf32, #tpu.memory_space<vmem>>, vector<1x128xf32>
    %77 = vector.broadcast %76 : vector<1x128xf32> to vector<16x128xf32>
    %78 = arith.addf %75, %77 : vector<16x128xf32>
    %cst_27 = arith.constant 0.000000e+00 : f32
    %79 = vector.broadcast %cst_27 : f32 to vector<16x128xf32>
    %80 = arith.maximumf %78, %79 : vector<16x128xf32>
    %c1_i32_28 = arith.constant 1 : i32
    %81 = tpu.dynamic_rotate %80 by %c1_i32_28 dim 0 : vector<16x128xf32>, i32 -> vector<16x128xf32>
    %cst_29 = arith.constant 0.000000e+00 : f32
    %82 = vector.shape_cast %19 : vector<16x1xi1> to vector<16x1xi1>
    %83 = vector.broadcast %82 : vector<16x1xi1> to vector<16x128xi1>
    %84 = vector.broadcast %cst_29 : f32 to vector<16x128xf32>
    %85 = arith.select %83, %84, %81 : vector<16x128xi1>, vector<16x128xf32>
    %c15_i32_30 = arith.constant 15 : i32
    %86 = tpu.dynamic_rotate %80 by %c15_i32_30 dim 0 : vector<16x128xf32>, i32 -> vector<16x128xf32>
    %cst_31 = arith.constant 0.000000e+00 : f32
    %87 = vector.shape_cast %37 : vector<16x1xi1> to vector<16x1xi1>
    %88 = vector.broadcast %87 : vector<16x1xi1> to vector<16x128xi1>
    %89 = vector.broadcast %cst_31 : f32 to vector<16x128xf32>
    %90 = arith.select %88, %89, %86 : vector<16x128xi1>, vector<16x128xf32>
    %91 = tpu.concatenate %85, %80, %90 in 1 : vector<16x128xf32>, vector<16x128xf32>, vector<16x128xf32> -> vector<16x384xf32>
    %92 = arith.truncf %91 : vector<16x384xf32> to vector<16x384xbf16>
    %c0_32 = arith.constant 0 : index
    %c0_33 = arith.constant 0 : index
    %93 = vector.load %arg5[%c0_32, %c0_33] : memref<384x128xbf16, #tpu.memory_space<vmem>>, vector<384x128xbf16>
    %cst_34 = arith.constant dense<0.000000e+00> : vector<16x128xf32>
    %94 = tpu.matmul %92, %93, %cst_34 {dimension_numbers = #tpu.dot_dimension_numbers<[1], [0], [0], [1], [0, 0, 1, 1], [], []>} : vector<16x384xbf16>, vector<384x128xbf16>, vector<16x128xf32> -> vector<16x128xf32>
    %c0_35 = arith.constant 0 : index
    %c0_36 = arith.constant 0 : index
    %95 = vector.load %arg6[%c0_35, %c0_36] : memref<1x128xf32, #tpu.memory_space<vmem>>, vector<1x128xf32>
    %96 = vector.broadcast %95 : vector<1x128xf32> to vector<16x128xf32>
    %97 = arith.addf %94, %96 : vector<16x128xf32>
    %cst_37 = arith.constant dense<0.000000e+00> : vector<16xf32>
    %98 = vector.multi_reduction <add>, %97, %cst_37 [1] : vector<16x128xf32> to vector<16xf32>
    %99 = vector.shape_cast %98 : vector<16xf32> to vector<16x1xf32>
    %cst_38 = arith.constant 3.125000e-02 : f32
    %100 = vector.broadcast %cst_38 : f32 to vector<16x1xf32>
    %101 = arith.mulf %99, %100 : vector<16x1xf32>
    %102 = arith.mulf %97, %97 : vector<16x128xf32>
    %cst_39 = arith.constant dense<0.000000e+00> : vector<16xf32>
    %103 = vector.multi_reduction <add>, %102, %cst_39 [1] : vector<16x128xf32> to vector<16xf32>
    %104 = vector.shape_cast %103 : vector<16xf32> to vector<16x1xf32>
    %cst_40 = arith.constant 3.125000e-02 : f32
    %105 = vector.broadcast %cst_40 : f32 to vector<16x1xf32>
    %106 = arith.mulf %104, %105 : vector<16x1xf32>
    %107 = arith.mulf %101, %101 : vector<16x1xf32>
    %108 = arith.subf %106, %107 : vector<16x1xf32>
    %109 = vector.broadcast %101 : vector<16x1xf32> to vector<16x128xf32>
    %110 = arith.subf %97, %109 : vector<16x128xf32>
    %cst_41 = arith.constant 9.99999974E-6 : f32
    %111 = vector.broadcast %cst_41 : f32 to vector<16x1xf32>
    %112 = arith.addf %108, %111 : vector<16x1xf32>
    %113 = math.rsqrt %112 : vector<16x1xf32>
    %114 = vector.broadcast %113 : vector<16x1xf32> to vector<16x128xf32>
    %115 = arith.mulf %110, %114 : vector<16x128xf32>
    %c0_42 = arith.constant 0 : index
    %c0_43 = arith.constant 0 : index
    %116 = vector.load %arg7[%c0_42, %c0_43] : memref<1x128xf32, #tpu.memory_space<vmem>>, vector<1x128xf32>
    %117 = vector.broadcast %116 : vector<1x128xf32> to vector<16x128xf32>
    %118 = arith.mulf %115, %117 : vector<16x128xf32>
    %c0_44 = arith.constant 0 : index
    %c0_45 = arith.constant 0 : index
    %119 = vector.load %arg8[%c0_44, %c0_45] : memref<1x128xf32, #tpu.memory_space<vmem>>, vector<1x128xf32>
    %120 = vector.broadcast %119 : vector<1x128xf32> to vector<16x128xf32>
    %121 = arith.addf %118, %120 : vector<16x128xf32>
    %cst_46 = arith.constant 0.000000e+00 : f32
    %122 = vector.broadcast %cst_46 : f32 to vector<16x128xf32>
    %123 = arith.maximumf %121, %122 : vector<16x128xf32>
    %c0_47 = arith.constant 0 : index
    %c0_48 = arith.constant 0 : index
    %124 = vector.load %arg9[%c0_47, %c0_48] : memref<1x128xf32, #tpu.memory_space<vmem>>, vector<1x128xf32>
    %125 = vector.broadcast %124 : vector<1x128xf32> to vector<16x128xf32>
    %126 = arith.mulf %123, %125 : vector<16x128xf32>
    %cst_49 = arith.constant dense<0.000000e+00> : vector<16xf32>
    %127 = vector.multi_reduction <add>, %126, %cst_49 [1] : vector<16x128xf32> to vector<16xf32>
    %128 = vector.shape_cast %127 : vector<16xf32> to vector<16x1xf32>
    %c0_50 = arith.constant 0 : index
    %129 = memref.load %arg12[%c0_50] : memref<1xf32, #tpu.memory_space<smem>>
    %130 = vector.broadcast %129 : f32 to vector<16x1xf32>
    %131 = arith.addf %128, %130 : vector<16x1xf32>
    %cst_51 = arith.constant 1.000000e+00 : f32
    %132 = vector.broadcast %cst_51 : f32 to vector<16x1xf32>
    %133 = arith.mulf %131, %132 : vector<16x1xf32>
    %cst_52 = arith.constant 0.000000e+00 : f32
    %cst_53 = arith.constant 1.000000e+00 : f32
    %134 = vector.broadcast %cst_52 : f32 to vector<16x1xf32>
    %135 = arith.maximumf %134, %133 : vector<16x1xf32>
    %136 = vector.broadcast %cst_53 : f32 to vector<16x1xf32>
    %137 = arith.minimumf %136, %135 : vector<16x1xf32>
    %c0_54 = arith.constant 0 : index
    %c0_55 = arith.constant 0 : index
    %138 = vector.load %arg10[%c0_54, %c0_55] : memref<1x128xf32, #tpu.memory_space<vmem>>, vector<1x128xf32>
    %139 = vector.broadcast %138 : vector<1x128xf32> to vector<16x128xf32>
    %140 = vector.broadcast %137 : vector<16x1xf32> to vector<16x128xf32>
    %141 = arith.cmpf olt, %139, %140 : vector<16x128xf32>
    %142 = arith.extui %141 : vector<16x128xi1> to vector<16x128xi32>
    %cst_56 = arith.constant dense<0> : vector<16xi32>
    %143 = vector.multi_reduction <add>, %142, %cst_56 [1] : vector<16x128xi32> to vector<16xi32>
    %144 = vector.shape_cast %143 : vector<16xi32> to vector<16x1xi32>
    %145 = tpu.iota {dimensions = array<i32: 1>} : vector<16x128xi32>
    %146 = vector.broadcast %144 : vector<16x1xi32> to vector<16x128xi32>
    %147 = arith.cmpi eq, %145, %146 : vector<16x128xi32>
    %148 = arith.extui %147 : vector<16x128xi1> to vector<16x128xi32>
    %149 = arith.sitofp %148 : vector<16x128xi32> to vector<16x128xf32>
    %150 = arith.truncf %149 : vector<16x128xf32> to vector<16x128xbf16>
    %c0_57 = arith.constant 0 : index
    %c0_58 = arith.constant 0 : index
    %151 = vector.load %arg11[%c0_57, %c0_58] : memref<128x128xbf16, #tpu.memory_space<vmem>>, vector<128x128xbf16>
    %cst_59 = arith.constant dense<0.000000e+00> : vector<16x128xf32>
    %152 = tpu.matmul %150, %151, %cst_59 {dimension_numbers = #tpu.dot_dimension_numbers<[1], [0], [0], [1], [0, 0, 1, 1], [], []>} : vector<16x128xbf16>, vector<128x128xbf16>, vector<16x128xf32> -> vector<16x128xf32>
    %153 = arith.addf %0, %152 : vector<16x128xf32>
    %c0_60 = arith.constant 0 : index
    %c0_61 = arith.constant 0 : index
    %154 = vector.load %arg13[%c0_60, %c0_61] : memref<16x128xf32, #tpu.memory_space<vmem>>, vector<16x128xf32>
    tpu.vector_store %arg13[%c0_60, %c0_61], %153 {strides = array<i32>} : memref<16x128xf32, #tpu.memory_space<vmem>>, vector<16x128xf32>,
    %155 = vector.shape_cast %131 : vector<16x1xf32> to vector<16x1xf32>
    %156 = vector.broadcast %155 : vector<16x1xf32> to vector<16x128xf32>
    %c0_62 = arith.constant 0 : index
    %c0_63 = arith.constant 0 : index
    %157 = vector.load %arg14[%c0_62, %c0_63] : memref<16x128xf32, #tpu.memory_space<vmem>>, vector<16x128xf32>
    tpu.vector_store %arg14[%c0_62, %c0_63], %156 {strides = array<i32>} : memref<16x128xf32, #tpu.memory_space<vmem>>, vector<16x128xf32>,
    return
  }
}

</mosaic_0001>

<bundles_post_ra>
// kernel: tpu_custom_call.1
= control target key start
LH: loop header
LB: loop body
LE: loop exit
PB: predicated region body
PF: predicated region fallthrough
CT: control target
= control target key end

     0   :  { %21 = vsyncpa [#allocation4], 0  ;;  %s1748_s0 = inlined_call_operand.hbm [shape: f32[16,128], index: 0, kind: input, shape index: {}]   ;;  %s1749_s1 = inlined_call_operand.hbm [shape: bf16[384,128], index: 1, kind: input, shape index: {}]   ;;  %s1750_s2 = inlined_call_operand.vmem [shape: f32[1,128], index: 2, kind: input, shape index: {}]   ;;  %s1751_s3 = inlined_call_operand.vmem [shape: f32[1,128], index: 3, kind: input, shape index: {}]   ;;  %s1752_s4 = inlined_call_operand.vmem [shape: f32[1,128], index: 4, kind: input, shape index: {}]   ;;  %s1753_s5 = inlined_call_operand.hbm [shape: bf16[384,128], index: 5, kind: input, shape index: {}]   ;;  %s1754_s6 = inlined_call_operand.vmem [shape: f32[1,128], index: 6, kind: input, shape index: {}]   ;;  %s1755_s7 = inlined_call_operand.vmem [shape: f32[1,128], index: 7, kind: input, shape index: {}]   ;;  %s1756_s8 = inlined_call_operand.vmem [shape: f32[1,128], index: 8, kind: input, shape index: {}]   ;;  %s1757_s9 = inlined_call_operand.vmem [shape: f32[1,128], index: 9, kind: input, shape index: {}]   ;;  %s1758_s10 = inlined_call_operand.vmem [shape: f32[1,128], index: 10, kind: input, shape index: {}]   ;;  %s1759_s11 = inlined_call_operand.hbm [shape: bf16[128,128], index: 11, kind: input, shape index: {}]   ;;  %s1760_s12 = inlined_call_operand.<no memory space> [shape: f32[1], index: 12, kind: input, shape index: {}]   ;;  %s1761_s13 = inlined_call_operand.hbm [shape: f32[16,128], index: 13, kind: output, shape index: {0}]   ;;  %s1762_s14 = inlined_call_operand.hbm [shape: f32[16,128], index: 14, kind: output, shape index: {1}]  }
   0x1   :  { %22 = vsyncpa [#allocation7], 0 }
   0x2   :  { %23 = vsyncpa [#allocation10], 0 }
   0x3   :  { %24 = vsyncpa [#allocation5], 0 }
   0x4   :  { %25 = vsyncpa [#allocation13], 0  ;;  %s1474_s29 = smov [#allocation6]  }
   0x5   :  { %s43_s30 = sshll.u32 %s1474_s29, 4  ;;  %s44_s30 = int_to_ptr.vmem [resolvable:$true] %s43_s30 }
   0x6   :  { %s1352_s15 = scalar_lea.vmem %s44_s30, 3072  ;;  %p1357_p1 = scmp.lt.s32.totalorder %s44_s30, %s44_s30 }
   0x7   :  { %p1353_p0 = scmp.ne.s32.totalorder %s44_s30, %s1352_s15  ;;  %p1358_p2 = scmp.lt.s32.totalorder %s1352_s15, %s1352_s15 }
   0x9   :  { %p1359_p3 = por %p1358_p2, %p1357_p1 }
   0xb   :  { %p1360_p4 = pnand %p1359_p3, %p1353_p0 }
   0xd   :  { %1363 = shalt.err (!%p1360_p4)
}
   0xe   :  { %s1475_s16 = smov 64   ;;  %s1476_s17 = smov 4  }
   0xf   :  { %49 = dma.hbm_to_vmem [thread:$0]  %s1749_s1, 3072, %s44_s30, [#allocation7], %s1475_s16, %s1475_s16, %s1476_s17  }
  0x10   :  { %s1477_s20 = smov [#allocation3]  }
  0x11   :  { %s31_s21 = sshll.u32 %s1477_s20, 4  ;;  %s32_s21 = int_to_ptr.vmem [resolvable:$true] %s31_s21 }
  0x12   :  { %s1372_s22 = scalar_lea.vmem %s32_s21, 256  ;;  %p1377_p6 = scmp.lt.s32.totalorder %s32_s21, %s32_s21 }
  0x13   :  { %p1373_p5 = scmp.ne.s32.totalorder %s32_s21, %s1372_s22  ;;  %p1378_p7 = scmp.lt.s32.totalorder %s1372_s22, %s1372_s22 }
  0x15   :  { %p1379_p8 = por %p1378_p7, %p1377_p6 }
  0x17   :  { %p1380_p9 = pnand %p1379_p8, %p1373_p5 }
  0x19   :  { %1383 = shalt.err (!%p1380_p9)
}
  0x1a   :  { %s1478_s23 = smov 128   ;;  %s1479_s24 = smov 8  }
  0x1b   :  { %37 = dma.hbm_to_vmem [thread:$0]  %s1748_s0, 256, %s32_s21, [#allocation4], %s1478_s23, %s1478_s23, %s1479_s24  }
  0x1c   :  { %s1480_s1 = smov [#allocation8]   ;;  %s1481_s28 = smov [#allocation9]  }
  0x1d   :  { %s61_s27 = sshll.u32 %s1480_s1, 4  ;;  %s83_s29 = sshll.u32 %s1481_s28, 4  ;;  %s62_s27 = int_to_ptr.vmem [resolvable:$true] %s61_s27  ;;  %s84_s29 = int_to_ptr.vmem [resolvable:$true] %s83_s29 }
  0x1e   :  { %s1392_s30 = scalar_lea.vmem %s62_s27, 3072  ;;  %p1397_p11 = scmp.lt.s32.totalorder %s62_s27, %s62_s27 }
  0x1f   :  { %p1393_p10 = scmp.ne.s32.totalorder %s62_s27, %s1392_s30  ;;  %p1398_p12 = scmp.lt.s32.totalorder %s1392_s30, %s1392_s30 }
  0x21   :  { %p1399_p13 = por %p1398_p12, %p1397_p11 }
  0x23   :  { %p1400_p0 = pnand %p1399_p13, %p1393_p10 }
  0x25   :  { %1403 = shalt.err (!%p1400_p0)
}
  0x26   :  { %67 = dma.hbm_to_vmem [thread:$0]  %s1753_s5, 3072, %s62_s27, [#allocation7], %s1475_s16, %s1475_s16, %s1476_s17  }
  0x27   :  { %s1412_s0 = scalar_lea.vmem %s84_s29, 1024  ;;  %p1417_p2 = scmp.lt.s32.totalorder %s84_s29, %s84_s29 }
  0x28   :  { %p1413_p1 = scmp.ne.s32.totalorder %s84_s29, %s1412_s0  ;;  %p1418_p3 = scmp.lt.s32.totalorder %s1412_s0, %s1412_s0 }
  0x2a   :  { %p1419_p4 = por %p1418_p3, %p1417_p2 }
  0x2c   :  { %p1420_p5 = pnand %p1419_p4, %p1413_p1 }
  0x2e   :  { %1423 = shalt.err (!%p1420_p5)
}
  0x2f   :  { %89 = dma.hbm_to_vmem [thread:$0]  %s1759_s11, 1024, %s84_s29, [#allocation10], %s1475_s16, %s1475_s16, %s1476_s17  }
  0x30   :  { %1464 = dma.done.wait [#allocation4], 256  }
  0x31   :  { %1465 = vsyncadd [#allocation4], 4294967040 }
  0x32   :  { %1466 = dma.done.wait [#allocation7], 6144  }
  0x33   :  { %1467 = vsyncadd [#allocation7], 4294961152 }
  0x34   :  { %1468 = dma.done.wait [#allocation10], 1024  }
  0x35   :  { %1469 = vsyncadd [#allocation10], 4294966272  ;;  %v1482_v0 = vmov 0.0   ;;  %vm1483_vm0 = vmmov 0   ;;  %v1280_v1 = vld [vmem:[#allocation6 + $0x78] sm:$0xff]   ;;  %v1283_v4 = vld [vmem:[#allocation6 + $0x70] sm:$0xff]   ;;  %v107_v7 = vlaneseq }
  0x36   :  { %1206 = vmatprep.subr.bf16.mxu1 %v1482_v0  ;;  %1222 = vmatprep.mubr.msk.bf16.mxu1 %vm1483_vm0, %v1482_v0  ;;  %v1281_v2 = vld [vmem:[#allocation6 + $0x38] sm:$0xff]   ;;  %v1284_v5 = vld [vmem:[#allocation6 + $0x30] sm:$0xff]   ;;  %v1286_v8 = vld [vmem:[#allocation6 + $0x68] sm:$0xff]  }
  0x37   :  { %1135 = vmatprep.subr.bf16.mxu0 %v1280_v1  ;;  %v1282_v3 = vld [vmem:[#allocation6 + $0xb8] sm:$0xff]   ;;  %v1285_v6 = vld [vmem:[#allocation6 + $0xb0] sm:$0xff]   ;;  %v1287_v9 = vld [vmem:[#allocation6 + $0x28] sm:$0xff]   ;;  %v1593_v12 = vshrl.u32 %v107_v7, 7 }
  0x38   :  { %1136 = vmatpush3.bf16.msra.mxu0 %v1281_v2  ;;  %1207 = vmatpush3.bf16.msra.mxu1 %v1282_v3  ;;  %v1288_v10 = vld [vmem:[#allocation6 + $0xa8] sm:$0xff]   ;;  %v1289_v11 = vld [vmem:[#allocation6 + $0x60] sm:$0xff]   ;;  %v1292_v15 = vld [vmem:[#allocation6 + $0x58] sm:$0xff]  }
  0x39   :  { %1137 = vmatprep.subr.bf16.mxu0 %v1283_v4  ;;  %1208 = vmatprep.subr.bf16.mxu1 %v1482_v0  ;;  %v1290_v13 = vld [vmem:[#allocation6 + $0x20] sm:$0xff]   ;;  %v109_v16 = vadd.s32 8, %v1593_v12  ;;  %v1293_v17 = vld [vmem:[#allocation6 + $0x18] sm:$0xff]   ;;  %v114_v19 = vand.u32 7, %v1593_v12  ;;  %v1295_v20 = vld [vmem:[#allocation6 + $0x50] sm:$0xff]   ;;  %vm140_vm5 = vcmp.lt.s32.totalorder %v1593_v12, 1 }
  0x3a   :  { %v1291_v14 = vld [vmem:[#allocation6 + $0xa0] sm:$0xff]   ;;  %v1294_v18 = vld [vmem:[#allocation6 + $0x98] sm:$0xff]   ;;  %v1296_v22 = vld [vmem:[#allocation6 + $0x10] sm:$0xff]   ;;  %vm151_vm7 = vcmp.lt.s32.totalorder %v1593_v12, 7 }
  0x3b   :  { %v121_v21 = vand.u32 7, %v109_v16  ;;  %v1297_v23 = vld [vmem:[#allocation6 + $0x90] sm:$0xff]   ;;  %vm1599_vm1 = vcmp.ne.s32.totalorder %v114_v19, 0  ;;  %v1298_v25 = vld [vmem:[#allocation6 + $0x48] sm:$0xff]   ;;  %vm1603_vm2 = vcmp.ne.s32.totalorder %v114_v19, 7  ;;  %v1301_v31 = vld [vmem:[#allocation6 + $0x40] sm:$0xff]  }
  0x3c   :  { %1138 = vmatpush3.bf16.msra.mxu0 %v1284_v5  ;;  %1209 = vmatpush3.bf16.msra.mxu1 %v1285_v6  ;;  %v1299_v27 = vld [vmem:[#allocation6 + $0x8] sm:$0xff]   ;;  %v1616_v32 = vld [vmem:[#allocation3] sm:$0xff]  ;;  %v1618_v33 = vld [vmem:[#allocation3 + $0x8] sm:$0xff] }
  0x3d   :  { %1139 = vmatprep.subr.bf16.mxu0 %v1286_v8  ;;  %1210 = vmatprep.subr.bf16.mxu1 %v1482_v0  ;;  %vm1608_vm3 = vcmp.ne.s32.totalorder %v121_v21, 0  ;;  %v1300_v29 = vld [vmem:[#allocation6 + $0x88] sm:$0xff]   ;;  %vm1612_vm4 = vcmp.ne.s32.totalorder %v121_v21, 7  ;;  %v1302_v34 = vld [vmem:[#allocation6] sm:$0xff]   ;;  %v138_v35 = vrot.slane %v1616_v32, 7  ;;  %v139_v36 = vrot.slane %v1618_v33, 7 }
  0x3e   :  { %vm1070_vm6 = vmpackc.low %vm1608_vm3, %vm1599_vm1  ;;  %v149_v37 = vrot.slane %v1616_v32, 1  ;;  %v150_v38 = vrot.slane %v1618_v33, 1  ;;  %v1303_v39 = vld [vmem:[#allocation6 + $0x80] sm:$0xff]   ;;  %v161_v40 = vpack.c.bf16 %v1618_v33, %v1616_v32  ;;  %v1043_v49 = vld [vmem:[%s1750_s2] ss:$0 sm:$0xff] }
  0x3f   :  { %vm1075_vm8 = vmpackc.low %vm1612_vm4, %vm1603_vm2  ;;  %v141_v41 = vsel %vm140_vm5, %v138_v35, %v139_v36  ;;  %v142_v42 = vsel %vm140_vm5, %v139_v36, %v138_v35  ;;  %v1304_v1 = vld [vmem:[#allocation8 + $0x78] sm:$0xff]   ;;  %v1307_v4 = vld [vmem:[#allocation8 + $0x70] sm:$0xff]  }
  0x40   :  { %1140 = vmatpush3.bf16.msra.mxu0 %v1287_v9  ;;  %1211 = vmatpush3.bf16.msra.mxu1 %v1288_v10  ;;  %v152_v43 = vsel %vm151_vm7, %v149_v37, %v150_v38  ;;  %v153_v44 = vsel %vm151_vm7, %v150_v38, %v149_v37  ;;  %v1071_v45 = vpack.c.bf16 %v141_v41, %v142_v42  ;;  %v1305_v2 = vld [vmem:[#allocation8 + $0x38] sm:$0xff]   ;;  %v1308_v5 = vld [vmem:[#allocation8 + $0x30] sm:$0xff]   ;;  %v1310_v8 = vld [vmem:[#allocation8 + $0x68] sm:$0xff]  }
  0x41   :  { %1141 = vmatprep.subr.bf16.mxu0 %v1289_v11  ;;  %1212 = vmatprep.subr.bf16.mxu1 %v1482_v0  ;;  %v1076_v46 = vpack.c.bf16 %v153_v44, %v152_v43  ;;  %v1306_v3 = vld [vmem:[#allocation8 + $0xb8] sm:$0xff]   ;;  %v1309_v6 = vld [vmem:[#allocation8 + $0xb0] sm:$0xff]   ;;  %v1311_v9 = vld [vmem:[#allocation8 + $0x28] sm:$0xff]  }
  0x42   :  { %394 = vmatprep.mubr.bf16.mxu0 %v161_v40  ;;  %v1312_v10 = vld [vmem:[#allocation8 + $0xa8] sm:$0xff]   ;;  %v1313_v11 = vld [vmem:[#allocation8 + $0x60] sm:$0xff]   ;;  %v1317_v16 = vld [vmem:[#allocation8 + $0x18] sm:$0xff]  }
  0x43   :  { %v1320_v19 = vld [vmem:[#allocation8 + $0x10] sm:$0xff]   ;;  %v1322_v21 = vld [vmem:[#allocation8 + $0x48] sm:$0xff]  }
  0x44   :  { %1142 = vmatpush3.bf16.msra.mxu0 %v1290_v13  ;;  %1213 = vmatpush3.bf16.msra.mxu1 %v1291_v14  ;;  %v1314_v13 = vld [vmem:[#allocation8 + $0x20] sm:$0xff]  }
  0x45   :  { %1143 = vmatprep.subr.bf16.mxu0 %v1292_v15  ;;  %1214 = vmatprep.subr.bf16.mxu1 %v1482_v0  ;;  %v1315_v14 = vld [vmem:[#allocation8 + $0xa0] sm:$0xff]   ;;  %v1316_v15 = vld [vmem:[#allocation8 + $0x58] sm:$0xff]  }
  0x48   :  { %1144 = vmatpush3.bf16.msra.mxu0 %v1293_v17  ;;  %1215 = vmatpush3.bf16.msra.mxu1 %v1294_v18  ;;  %v1318_v17 = vld [vmem:[#allocation8 + $0x98] sm:$0xff]   ;;  %v1319_v18 = vld [vmem:[#allocation8 + $0x50] sm:$0xff]  }
  0x49   :  { %1145 = vmatprep.subr.bf16.mxu0 %v1295_v20  ;;  %1216 = vmatprep.subr.bf16.mxu1 %v1482_v0  ;;  %v1321_v20 = vld [vmem:[#allocation8 + $0x90] sm:$0xff]  }
  0x4c   :  { %1146 = vmatpush3.bf16.msra.mxu0 %v1296_v22  ;;  %1217 = vmatpush3.bf16.msra.mxu1 %v1297_v23  ;;  %v1323_v22 = vld [vmem:[#allocation8 + $0x8] sm:$0xff]  }
  0x4d   :  { %1147 = vmatprep.subr.bf16.mxu0 %v1298_v25  ;;  %1218 = vmatprep.subr.bf16.mxu1 %v1482_v0  ;;  %v1324_v23 = vld [vmem:[#allocation8 + $0x88] sm:$0xff]   ;;  %v1325_v25 = vld [vmem:[#allocation8 + $0x40] sm:$0xff]  }
  0x50   :  { %1148 = vmatpush3.bf16.msra.mxu0 %v1299_v27  ;;  %1219 = vmatpush3.bf16.msra.mxu1 %v1300_v29  ;;  %v1326_v27 = vld [vmem:[#allocation8] sm:$0xff]  }
  0x51   :  { %1149 = vmatprep.subr.bf16.mxu0 %v1301_v31  ;;  %1220 = vmatprep.subr.bf16.mxu1 %v1482_v0  ;;  %v1327_v29 = vld [vmem:[#allocation8 + $0x80] sm:$0xff]  }
  0x54   :  { %1150 = vmatpush3.bf16.msra.mxu0 %v1302_v34  ;;  %1221 = vmatpush3.bf16.msra.mxu1 %v1303_v39 }
  0x55   :  { %1226 = vmatprep.subr.bf16.mxu1 %v1482_v0  ;;  %1166 = vmatprep.subr.bf16.mxu0 %v1304_v1 }
  0x57   :  { %1072 = vmatmul.mubr.msk.bf16.vlgmr.msra.gmra.mxu0 %vm1070_vm6, %v1071_v45  ;;  %1223 = vmatmul.mubr.msk.bf16.vlgmr.msra.gmra.mxu1 %vm1075_vm8, %v1076_v46 }
  0x58   :  { %1242 = vmatprep.mubr.msk.bf16.mxu1 %vm1483_vm0, %v1482_v0  ;;  %1167 = vmatpush3.bf16.msra.mxu0 %v1305_v2 }
  0x59   :  { %1227 = vmatpush3.bf16.msra.mxu1 %v1306_v3  ;;  %1168 = vmatprep.subr.bf16.mxu0 %v1307_v4 }
  0x5a   :  { %1228 = vmatprep.subr.bf16.mxu1 %v1482_v0 }
  0x5c   :  { %1169 = vmatpush3.bf16.msra.mxu0 %v1308_v5 }
  0x5d   :  { %1229 = vmatpush3.bf16.msra.mxu1 %v1309_v6  ;;  %1170 = vmatprep.subr.bf16.mxu0 %v1310_v8 }
  0x5e   :  { %1230 = vmatprep.subr.bf16.mxu1 %v1482_v0 }
  0x60   :  { %1171 = vmatpush3.bf16.msra.mxu0 %v1311_v9 }
  0x61   :  { %1231 = vmatpush3.bf16.msra.mxu1 %v1312_v10  ;;  %1172 = vmatprep.subr.bf16.mxu0 %v1313_v11  ;;  %v1080_v11 = vld [vmem:[%s1754_s6] ss:$0 sm:$0xff] }
  0x62   :  { %1232 = vmatprep.subr.bf16.mxu1 %v1482_v0 }
  0x64   :  { %1173 = vmatpush3.bf16.msra.mxu0 %v1314_v13 }
  0x65   :  { %1233 = vmatpush3.bf16.msra.mxu1 %v1315_v14  ;;  %1174 = vmatprep.subr.bf16.mxu0 %v1316_v15 }
  0x66   :  { %1234 = vmatprep.subr.bf16.mxu1 %v1482_v0 }
  0x68   :  { %1175 = vmatpush3.bf16.msra.mxu0 %v1317_v16 }
  0x69   :  { %1235 = vmatpush3.bf16.msra.mxu1 %v1318_v17  ;;  %1176 = vmatprep.subr.bf16.mxu0 %v1319_v18 }
  0x6a   :  { %1236 = vmatprep.subr.bf16.mxu1 %v1482_v0 }
  0x6c   :  { %1177 = vmatpush3.bf16.msra.mxu0 %v1320_v19 }
  0x6d   :  { %1237 = vmatpush3.bf16.msra.mxu1 %v1321_v20  ;;  %1178 = vmatprep.subr.bf16.mxu0 %v1322_v21 }
  0x6e   :  { %1238 = vmatprep.subr.bf16.mxu1 %v1482_v0 }
  0x70   :  { %1179 = vmatpush3.bf16.msra.mxu0 %v1323_v22 }
  0x71   :  { %1239 = vmatpush3.bf16.msra.mxu1 %v1324_v23  ;;  %1180 = vmatprep.subr.bf16.mxu0 %v1325_v25 }
  0x72   :  { %1240 = vmatprep.subr.bf16.mxu1 %v1482_v0 }
  0x74   :  { %1181 = vmatpush3.bf16.msra.mxu0 %v1326_v27 }
  0x75   :  { %1241 = vmatpush3.bf16.msra.mxu1 %v1327_v29  ;;  %1246 = vmatprep.subr.bf16.mxu0 %v1482_v0 }
 0x117   :  { %v1151_v47 = vpop.f32.mrf.mxu0  ;;  %v437_v48 = vpop.f32.mrf.mxu1 }
 0x119   :  { %v1152_v50 = vpop.f32.mrf.mxu0  ;;  %v1224_v52 = vpop.f32.mrf.mxu1 }
 0x11a   :  { %v1153_v51 = vadd.f32 %v1152_v50, %v1151_v47 }
 0x11b   :  { %v1154_v53 = vpop.f32.mrf.mxu0  ;;  %v440_v55 = vpop.f32.mrf.mxu1 }
 0x11c   :  { %v397_v54 = vadd.f32 %v1153_v51, %v1043_v49  ;;  %v1079_v51 = vld [vmem:[%s1752_s4] ss:$0 sm:$0xff] }
 0x11d   :  { %v1155_v56 = vpop.f32.mrf.mxu0  ;;  %v1225_v58 = vpop.f32.mrf.mxu1 }
 0x11e   :  { %v1156_v57 = vadd.f32 %v1155_v56, %v1154_v53  ;;  %v1662_v59 = vadd.f32 %v437_v48, %v397_v54 }
 0x120   :  { %v400_v60 = vadd.f32 %v1156_v57, %v1043_v49  ;;  %444 = vadd.xlane.f32.xlu0 %v1662_v59  ;;  %v450_v61 = vmul.f32 %v1662_v59, %v1662_v59  ;;  %v1078_v49 = vld [vmem:[%s1751_s3] ss:$0 sm:$0xff] }
 0x122   :  { %452 = vadd.xlane.f32.xlu1 %v450_v61  ;;  %v1667_v62 = vadd.f32 %v440_v55, %v400_v60 }
 0x124   :  { %446 = vadd.xlane.f32.xlu0 %v1667_v62  ;;  %v451_v63 = vmul.f32 %v1667_v62, %v1667_v62 }
 0x126   :  { %454 = vadd.xlane.f32.xlu1 %v451_v63 }
 0x1a9   :  { %v445_v31 = vpop.xlane.xlu0 %444 }
 0x1aa   :  { %v448_v34 = vmul.f32 0.03125, %v445_v31 }
 0x1ab   :  { %v453_v35 = vpop.xlane.xlu1 %452 }
 0x1ac   :  { %v458_v36 = vmul.f32 %v448_v34, %v448_v34  ;;  %v456_v37 = vmul.f32 0.03125, %v453_v35  ;;  %v462_v47 = vsub.f32 %v1662_v59, %v448_v34 }
 0x1ad   :  { %v447_v38 = vpop.xlane.xlu0 %446 }
 0x1ae   :  { %v460_v39 = vsub.f32 %v456_v37, %v458_v36  ;;  %v449_v40 = vmul.f32 0.03125, %v447_v38 }
 0x1af   :  { %v455_v41 = vpop.xlane.xlu1 %454 }
 0x1b0   :  { %v464_v42 = vadd.f32 1e-05, %v460_v39  ;;  %v459_v43 = vmul.f32 %v449_v40, %v449_v40  ;;  %v457_v44 = vmul.f32 0.03125, %v455_v41  ;;  %v463_v52 = vsub.f32 %v1667_v62, %v449_v40 }
 0x1b2   :  { %1336 = vrsqrt.f32 %v464_v42  ;;  %v461_v45 = vsub.f32 %v457_v44, %v459_v43 }
 0x1b4   :  { %v465_v46 = vadd.f32 1e-05, %v461_v45  ;;  %v1115_v45 = vld [vmem:[%s1755_s7] ss:$0 sm:$0xff] }
 0x1b6   :  { %1338 = vrsqrt.f32 %v465_v46 }
 0x1bf   :  { %v1337_v48 = vpop.eup %1336 }
 0x1c0   :  { %v468_v50 = vmul.f32 %v1337_v48, %v462_v47  ;;  %v1116_v47 = vld [vmem:[%s1756_s8] ss:$0 sm:$0xff] }
 0x1c2   :  { %v477_v53 = vmul.f32 %v1078_v49, %v468_v50 }
 0x1c3   :  { %v1339_v54 = vpop.eup %1338 }
 0x1c4   :  { %v469_v55 = vmul.f32 %v1339_v54, %v463_v52  ;;  %v486_v56 = vadd.f32 %v1079_v51, %v477_v53  ;;  %v1117_v53 = vld [vmem:[%s1757_s9] ss:$0 sm:$0xff] }
 0x1c6   :  { %v478_v57 = vmul.f32 %v1078_v49, %v469_v55  ;;  %v488_v58 = vmax.f32 %v486_v56, 0.0 }
 0x1c8   :  { %v487_v60 = vadd.f32 %v1079_v51, %v478_v57  ;;  %v490_v61 = vrot.slane %v488_v58, 7  ;;  %v496_v1 = vrot.slane %v488_v58, 1 }
 0x1ca   :  { %v489_v59 = vmax.f32 %v487_v60, 0.0 }
 0x1cc   :  { %v491_v63 = vrot.slane %v489_v59, 7  ;;  %v497_v2 = vrot.slane %v489_v59, 1  ;;  %v503_v3 = vpack.c.bf16 %v489_v59, %v488_v58  ;;  %v1328_v59 = vld [vmem:[#allocation9 + $0x38] sm:$0xff]  }
 0x1ce   :  { %736 = vmatprep.mubr.bf16.mxu0 %v503_v3  ;;  %v492_v4 = vsel %vm140_vm5, %v490_v61, %v491_v63  ;;  %v493_v62 = vsel %vm140_vm5, %v491_v63, %v490_v61  ;;  %v498_v5 = vsel %vm151_vm7, %v496_v1, %v497_v2  ;;  %v499_v6 = vsel %vm151_vm7, %v497_v2, %v496_v1  ;;  %v1329_v61 = vld [vmem:[#allocation9 + $0x30] sm:$0xff]   ;;  %v1330_v63 = vld [vmem:[#allocation9 + $0x28] sm:$0xff]   ;;  %v1331_v1 = vld [vmem:[#allocation9 + $0x20] sm:$0xff]  }
 0x1cf   :  { %v1108_v8 = vpack.c.bf16 %v492_v4, %v493_v62  ;;  %v1113_v9 = vpack.c.bf16 %v499_v6, %v498_v5  ;;  %v1332_v2 = vld [vmem:[#allocation9 + $0x18] sm:$0xff]   ;;  %v846_v3 = vstv %s1760_s12 }
 0x1d1   :  { %1109 = vmatmul.mubr.msk.bf16.vlgmr.msra.gmra.mxu0 %vm1070_vm6, %v1108_v8  ;;  %1243 = vmatmul.mubr.msk.bf16.vlgmr.msra.gmra.mxu1 %vm1075_vm8, %v1113_v9  ;;  %v1118_v8 = vld [vmem:[%s1758_s10] ss:$0 sm:$0xff]  ;;  %s1486_s10 = smov [#allocation12]  }
 0x1d2   :  { %1262 = vmatprep.mubr.msk.bf16.mxu0 %vm1483_vm0, %v1482_v0  ;;  %1247 = vmatpush3.bf16.msra.mxu0 %v1328_v59  ;;  %s1025_s12 = sshll.u32 %s1486_s10, 4  ;;  %s1026_s12 = int_to_ptr.vmem [resolvable:$true] %s1025_s12 }
 0x1d3   :  { %1248 = vmatprep.subr.bf16.mxu0 %v1482_v0  ;;  %s1424_s29 = scalar_lea.vmem %s1026_s12, 256  ;;  %p1429_p7 = scmp.lt.s32.totalorder %s1026_s12, %s1026_s12 }
 0x1d4   :  { %p1425_p6 = scmp.ne.s32.totalorder %s1026_s12, %s1424_s29  ;;  %p1430_p8 = scmp.lt.s32.totalorder %s1424_s29, %s1424_s29 }
 0x1d6   :  { %1249 = vmatpush3.bf16.msra.mxu0 %v1329_v61  ;;  %p1431_p9 = por %p1430_p8, %p1429_p7 }
 0x1d7   :  { %1250 = vmatprep.subr.bf16.mxu0 %v1482_v0 }
 0x1d8   :  { %p1432_p10 = pnand %p1431_p9, %p1425_p6 }
 0x1da   :  { %1251 = vmatpush3.bf16.msra.mxu0 %v1330_v63 }
 0x1db   :  { %1252 = vmatprep.subr.bf16.mxu0 %v1482_v0 }
 0x1de   :  { %1253 = vmatpush3.bf16.msra.mxu0 %v1331_v1 }
 0x1df   :  { %1254 = vmatprep.subr.bf16.mxu0 %v1482_v0 }
 0x1e2   :  { %1255 = vmatpush3.bf16.msra.mxu0 %v1332_v2 }
 0x1e3   :  { %1256 = vmatprep.subr.bf16.mxu0 %v1482_v0 }
 0x291   :  { %v1182_v10 = vpop.f32.mrf.mxu0  ;;  %v779_v12 = vpop.f32.mrf.mxu1 }
 0x293   :  { %v1183_v28 = vpop.f32.mrf.mxu0  ;;  %v1244_v13 = vpop.f32.mrf.mxu1 }
 0x294   :  { %v1184_v24 = vadd.f32 %v1183_v28, %v1182_v10 }
 0x295   :  { %v1185_v14 = vpop.f32.mrf.mxu0  ;;  %v782_v15 = vpop.f32.mrf.mxu1 }
 0x296   :  { %v739_v16 = vadd.f32 %v1184_v24, %v1080_v11 }
 0x297   :  { %v1186_v30 = vpop.f32.mrf.mxu0  ;;  %v1245_v17 = vpop.f32.mrf.mxu1 }
 0x298   :  { %v1187_v26 = vadd.f32 %v1186_v30, %v1185_v14  ;;  %v780_v18 = vadd.f32 %v779_v12, %v739_v16 }
 0x29a   :  { %v742_v19 = vadd.f32 %v1187_v26, %v1080_v11  ;;  %786 = vadd.xlane.f32.xlu0 %v780_v18  ;;  %v792_v21 = vmul.f32 %v780_v18, %v780_v18  ;;  %v1484_v11 = vmov 0  }
 0x29c   :  { %v783_v20 = vadd.f32 %v782_v15, %v742_v19 }
 0x29e   :  { %788 = vadd.xlane.f32.xlu1 %v783_v20  ;;  %794 = vadd.xlane.f32.xlu0 %v792_v21  ;;  %v793_v22 = vmul.f32 %v783_v20, %v783_v20  ;;  %v1334_v21 = vld [vmem:[#allocation9 + $0x8] sm:$0xff]  }
 0x2a2   :  { %796 = vadd.xlane.f32.xlu1 %v793_v22  ;;  %v1335_v22 = vld [vmem:[#allocation9] sm:$0xff]  }
 0x323   :  { %v787_v23 = vpop.xlane.xlu0 %786 }
 0x324   :  { %v790_v25 = vmul.f32 0.03125, %v787_v23 }
 0x326   :  { %v800_v31 = vmul.f32 %v790_v25, %v790_v25  ;;  %v804_v43 = vsub.f32 %v780_v18, %v790_v25 }
 0x327   :  { %v789_v27 = vpop.xlane.xlu1 %788  ;;  %v795_v29 = vpop.xlane.xlu0 %794 }
 0x328   :  { %v791_v34 = vmul.f32 0.03125, %v789_v27  ;;  %v798_v35 = vmul.f32 0.03125, %v795_v29 }
 0x32a   :  { %v802_v36 = vsub.f32 %v798_v35, %v800_v31  ;;  %v801_v38 = vmul.f32 %v791_v34, %v791_v34  ;;  %v805_v48 = vsub.f32 %v783_v20, %v791_v34  ;;  %v1333_v20 = vld [vmem:[#allocation9 + $0x10] sm:$0xff]  }
 0x32b   :  { %v797_v37 = vpop.xlane.xlu1 %796  ;;  %1257 = vmatpush3.bf16.msra.mxu0 %v1333_v20 }
 0x32c   :  { %v806_v39 = vadd.f32 1e-05, %v802_v36  ;;  %v799_v40 = vmul.f32 0.03125, %v797_v37  ;;  %1258 = vmatprep.subr.bf16.mxu0 %v1482_v0 }
 0x32e   :  { %1340 = vrsqrt.f32 %v806_v39  ;;  %v803_v41 = vsub.f32 %v799_v40, %v801_v38  ;;  %v889_v38 = vand.u32 127, %v107_v7 }
 0x32f   :  { %1259 = vmatpush3.bf16.msra.mxu0 %v1334_v21 }
 0x330   :  { %v807_v42 = vadd.f32 1e-05, %v803_v41  ;;  %1260 = vmatprep.subr.bf16.mxu0 %v1482_v0  ;;  %v1485_v0 = vmov 1.0|1.0  }
 0x332   :  { %1342 = vrsqrt.f32 %v807_v42 }
 0x333   :  { %1261 = vmatpush3.bf16.msra.mxu0 %v1335_v22 }
 0x33b   :  { %v1341_v44 = vpop.eup %1340 }
 0x33c   :  { %v810_v46 = vmul.f32 %v1341_v44, %v804_v43 }
 0x33e   :  { %v819_v49 = vmul.f32 %v1115_v45, %v810_v46 }
 0x33f   :  { %v1343_v50 = vpop.eup %1342 }
 0x340   :  { %v828_v51 = vadd.f32 %v1116_v47, %v819_v49  ;;  %v811_v52 = vmul.f32 %v1343_v50, %v805_v48 }
 0x342   :  { %v830_v54 = vmax.f32 %v828_v51, 0.0  ;;  %v820_v55 = vmul.f32 %v1115_v45, %v811_v52 }
 0x344   :  { %v839_v56 = vmul.f32 %v1117_v53, %v830_v54  ;;  %v829_v57 = vadd.f32 %v1116_v47, %v820_v55 }
 0x346   :  { %841 = vadd.xlane.f32.xlu0 %v839_v56  ;;  %v831_v58 = vmax.f32 %v829_v57, 0.0 }
 0x348   :  { %v840_v60 = vmul.f32 %v1117_v53, %v831_v58 }
 0x34a   :  { %843 = vadd.xlane.f32.xlu1 %v840_v60 }
 0x3cf   :  { %v842_v4 = vpop.xlane.xlu0 %841 }
 0x3d0   :  { %v847_v62 = vadd.f32 %v846_v3, %v842_v4 }
 0x3d2   :  { %v849_v5 = vmax.f32 %v847_v62, 0.0  ;;  %1006 = vst [vmem:[#allocation12] sm:$0xff] %v847_v62 }
 0x3d3   :  { %v844_v6 = vpop.xlane.xlu1 %843 }
 0x3d4   :  { %v851_v9 = vmin.f32 %v849_v5, 1.0  ;;  %v848_v10 = vadd.f32 %v846_v3, %v844_v6 }
 0x3d6   :  { %v850_v12 = vmax.f32 %v848_v10, 0.0  ;;  %1007 = vst [vmem:[#allocation12 + $0x8] sm:$0xff] %v848_v10  ;;  %vm860_vm9 = vcmp.lt.f32.partialorder %v1118_v8, %v851_v9 }
 0x3d7   :  { %v862_v28 = vsel %vm860_vm9, 1, %v1484_v11 }
 0x3d8   :  { %v852_v13 = vmin.f32 %v850_v12, 1.0  ;;  %v865_v24 = vshrl.u32 %v862_v28, 16  ;;  %v864_v15 = vand.u32 65535, %v862_v28 }
 0x3da   :  { %v867_v14 = vcvt.s32.f32 %v865_v24  ;;  %vm861_vm10 = vcmp.lt.f32.partialorder %v1118_v8, %v852_v13  ;;  %v866_v26 = vcvt.s32.f32 %v864_v15 }
 0x3db   :  { %v863_v16 = vsel %vm861_vm10, 1, %v1484_v11 }
 0x3dc   :  { %870 = vadd.xlane.f32.xlu0 %v867_v14  ;;  %v877_v30 = vshrl.u32 %v863_v16, 16  ;;  %v876_v18 = vand.u32 65535, %v863_v16 }
 0x3de   :  { %v879_v17 = vcvt.s32.f32 %v877_v30  ;;  %v878_v19 = vcvt.s32.f32 %v876_v18 }
 0x3e0   :  { %882 = vadd.xlane.f32.xlu1 %v879_v17  ;;  %868 = vadd.xlane.f32.xlu0 %v866_v26 }
 0x3e4   :  { %880 = vadd.xlane.f32.xlu1 %v878_v19 }
 0x465   :  { %v871_v23 = vpop.xlane.xlu0 %870 }
 0x466   :  { %v873_v25 = vcvt.f32.s32 %v871_v23 }
 0x468   :  { %v874_v35 = vshll.u32 %v873_v25, 16 }
 0x469   :  { %v883_v27 = vpop.xlane.xlu1 %882  ;;  %v869_v29 = vpop.xlane.xlu0 %868 }
 0x46a   :  { %v885_v31 = vcvt.f32.s32 %v883_v27  ;;  %v872_v34 = vcvt.f32.s32 %v869_v29 }
 0x46c   :  { %v886_v37 = vshll.u32 %v885_v31, 16  ;;  %v875_v39 = vadd.s32 %v874_v35, %v872_v34 }
 0x46d   :  { %v881_v36 = vpop.xlane.xlu1 %880 }
 0x46e   :  { %v884_v40 = vcvt.f32.s32 %v881_v36  ;;  %vm890_vm11 = vcmp.eq.s32.totalorder %v889_v38, %v875_v39 }
 0x470   :  { %v887_v41 = vadd.s32 %v886_v37, %v884_v40 }
 0x472   :  { %vm891_vm12 = vcmp.eq.s32.totalorder %v889_v38, %v887_v41 }
 0x473   :  { %vm1129_vm13 = vmpackc.low %vm891_vm12, %vm890_vm11 }
 0x474   :  { %1263 = vmatmul.mubr.msk.bf16.vlgmr.msra.gmra.mxu0 %vm1129_vm13, %v1485_v0 }
 0x475   :  { %1435 = shalt.err (!%p1432_p10)
}
 0x476   :  { %1031 = dma.vmem_to_hbm [thread:$0]  %s1026_s12, 256, %s1762_s14, [#allocation13], %s1478_s23, %s1478_s23, %s1479_s24  }
 0x477   :  { %s1487_s18 = smov [#allocation11]  }
 0x478   :  { %s1013_s0 = sshll.u32 %s1487_s18, 4  ;;  %s1014_s0 = int_to_ptr.vmem [resolvable:$true] %s1013_s0 }
 0x479   :  { %s1444_s19 = scalar_lea.vmem %s1014_s0, 256  ;;  %p1449_p12 = scmp.lt.s32.totalorder %s1014_s0, %s1014_s0 }
 0x47a   :  { %p1445_p11 = scmp.ne.s32.totalorder %s1014_s0, %s1444_s19  ;;  %p1450_p13 = scmp.lt.s32.totalorder %s1444_s19, %s1444_s19 }
 0x47c   :  { %p1451_p0 = por %p1450_p13, %p1449_p12 }
 0x47e   :  { %p1452_p1 = pnand %p1451_p0, %p1445_p11 }
 0x534   :  { %v995_v7 = vpop.f32.mrf.mxu0 }
 0x535   :  { %v1002_v42 = vadd.f32 %v995_v7, %v1616_v32 }
 0x536   :  { %v1264_v43 = vpop.f32.mrf.mxu0 }
 0x537   :  { %1004 = vst [vmem:[#allocation11] sm:$0xff] %v1002_v42 }
 0x538   :  { %v998_v44 = vpop.f32.mrf.mxu0 }
 0x539   :  { %v1003_v45 = vadd.f32 %v998_v44, %v1618_v33 }
 0x53a   :  { %v1265_v46 = vpop.f32.mrf.mxu0 }
 0x53b   :  { %1005 = vst [vmem:[#allocation11 + $0x8] sm:$0xff] %v1003_v45 }
 0x53c   :  { %1455 = shalt.err (!%p1452_p1)
}
 0x53d   :  { %1019 = dma.vmem_to_hbm [thread:$0]  %s1014_s0, 256, %s1761_s13, [#allocation5], %s1478_s23, %s1478_s23, %s1479_s24  }
 0x53e   :  { %1470 = dma.done.wait [#allocation5], 256  }
 0x53f   :  { %1471 = vsyncadd [#allocation5], 4294967040 }
 0x540   :  { %1472 = dma.done.wait [#allocation13], 256  }
 0x541   :  { %1473 = vsyncadd [#allocation13], 4294967040 }
 0x542   :  { %1038 = vsyncpa [#allocation4], 1 }
 0x543   :  { %1039 = vsyncpa [#allocation7], 1 }
 0x544   :  { %1040 = vsyncpa [#allocation10], 1 }
 0x545   :  { %1041 = vsyncpa [#allocation5], 1 }
 0x546   :  { %1042 = vsyncpa [#allocation13], 1 }

</bundles_post_ra>
